<compile_context>
chip_gen: v6e
topology: v6e:2x2x1
jax: 0.10.0
libtpu: 0.0.40
codegen_flags: <defaults>
</compile_context>

<pallas_src>
import jax
import jax.numpy as jnp
from jax.experimental import pallas as pl
from jax.experimental.pallas import tpu as pltpu


IN_FEATURES = 10
OUT_FEATURES = 1
PACK = 128                 # original rows packed into one lane-dense packed row
GRIDLESS_MAX_ROWS = 4096   # resident (padded) footprint ~4 MiB below this
TILE_R = 512               # packed rows per grid step -> 2.5 MiB useful x bytes/step


def _small_linear_kernel(b_ref, x_ref, w_ref, o_ref):
    """Gridless path: y = sum_k x[:, k] * w[k] + b  (VPU mul + XLU lane-reduce).

    b_ref: (1,)    f32 SMEM   -- bias scalar
    x_ref: (B, IN) f32 VMEM
    w_ref: (1, IN) f32 VMEM   -- weight row, broadcast over batch rows
    o_ref: (B, 1)  f32 VMEM
    """
    prod = x_ref[...] * w_ref[...]
    o_ref[...] = jnp.sum(prod, axis=-1, keepdims=True) + b_ref[0]


def _packed_linear_kernel(b_ref, xp_ref, wbd_ref, o_ref):
    """Lane-packed path: MXU contraction against a block-diagonal weight.

    b_ref:   (1,)              f32 SMEM
    xp_ref:  (tile_r, PACK*IN) f32 VMEM  -- 128 original rows per packed row
    wbd_ref: (PACK*IN, PACK)   f32 VMEM  -- wbd[j*IN + k, j] = w[k], else 0
    o_ref:   (tile_r, PACK)    f32 VMEM  -- lane-dense output slab
    """
    o_ref[...] = (
        jnp.dot(
            xp_ref[...],
            wbd_ref[...],
            preferred_element_type=jnp.float32,
            precision=jax.lax.Precision.HIGHEST,
        )
        + b_ref[0]
    )


def _small_forward(x, w_row, b_vec):
    B = x.shape[0]
    return pl.pallas_call(
        _small_linear_kernel,
        out_shape=jax.ShapeDtypeStruct((B, OUT_FEATURES), x.dtype),
        in_specs=[
            pl.BlockSpec(memory_space=pltpu.MemorySpace.SMEM),   # bias
            pl.BlockSpec(memory_space=pltpu.MemorySpace.VMEM),   # x (resident)
            pl.BlockSpec(memory_space=pltpu.MemorySpace.VMEM),   # weight row
        ],
        out_specs=pl.BlockSpec(memory_space=pltpu.MemorySpace.VMEM),
    )(b_vec, x, w_row)


def _packed_forward(x_main, w_bd, b_vec):
    B_main = x_main.shape[0]                      # multiple of PACK by construction
    R = B_main // PACK
    # Free contiguous reshape: x_packed[r, j*IN + k] == x[r*PACK + j, k].
    xp = x_main.reshape(R, PACK * IN_FEATURES)
    # tile_r: multiple of 8 (512) or the full extent R (satisfies (8,128) rule).
    tile_r = min(TILE_R, R)
    grid = (pl.cdiv(R, tile_r),)
    out_packed = pl.pallas_call(
        _packed_linear_kernel,
        out_shape=jax.ShapeDtypeStruct((R, PACK), x_main.dtype),
        grid=grid,
        in_specs=[
            pl.BlockSpec(memory_space=pltpu.MemorySpace.SMEM),                  # bias
            pl.BlockSpec((tile_r, PACK * IN_FEATURES), lambda i: (i, 0)),       # x tile
            pl.BlockSpec((PACK * IN_FEATURES, PACK), lambda i: (0, 0)),         # w_bd, resident
        ],
        out_specs=pl.BlockSpec((tile_r, PACK), lambda i: (i, 0)),               # lane-dense out
        compiler_params=pltpu.CompilerParams(
            dimension_semantics=("parallel",),
            vmem_limit_bytes=32 * 1024 * 1024,
        ),
    )(b_vec, xp, w_bd)
    # Free contiguous reshape back to (B_main, 1).
    return out_packed.reshape(B_main, OUT_FEATURES)


def simple_model_forward(x, weight, bias):
    """Pallas equivalent of SimpleModel.forward (nn.Linear(10, 1)).

    x:      (B, 10) f32
    weight: (1, 10) f32   (PyTorch layout: (out_features, in_features))
    bias:   (1,)    f32
    returns (B, 1)  f32
    """
    B, in_f = x.shape
    assert in_f == IN_FEATURES
    w_row = weight.reshape(1, IN_FEATURES).astype(x.dtype)
    b_vec = bias.reshape(OUT_FEATURES).astype(x.dtype)

    if B <= GRIDLESS_MAX_ROWS:
        # Small/medium batch: single bulk DMA, everything VMEM-resident, no grid.
        return _small_forward(x, w_row, b_vec)

    # Large batch: lane-packed HBM-roofline path on the PACK-aligned prefix.
    B_main = (B // PACK) * PACK
    w_flat = weight.reshape(IN_FEATURES).astype(x.dtype)
    eye = jnp.eye(PACK, dtype=x.dtype)
    # w_bd[j*IN + k, j2] = w[k] if j == j2 else 0   -> block-diagonal (1280, 128)
    w_bd = (eye[:, None, :] * w_flat[None, :, None]).reshape(
        PACK * IN_FEATURES, PACK
    )

    out_main = _packed_forward(x[:B_main], w_bd, b_vec)
    if B_main == B:
        return out_main
    # Remainder (< 128 rows): tiny gridless path, then concatenate.
    out_tail = _small_forward(x[B_main:], w_row, b_vec)
    return jnp.concatenate([out_main, out_tail], axis=0)


if __name__ == "__main__":
    key = jax.random.PRNGKey(0)
    k_x, k_w, k_b, k_x2 = jax.random.split(key, 4)

    B, IN, OUT = 8, 10, 1

    # Deterministic parameter init (mimics nn.Linear's uniform(-1/sqrt(IN), 1/sqrt(IN))).
    bound = 1.0 / (IN ** 0.5)
    weight = jax.random.uniform(k_w, (OUT, IN), jnp.float32, -bound, bound)
    bias = jax.random.uniform(k_b, (OUT,), jnp.float32, -bound, bound)
    x = jax.random.normal(k_x, (B, IN), dtype=jnp.float32)

    # Exact elementwise f32 reference (avoids XLA matmul-precision ambiguity).
    def ref_fn(xx):
        return jnp.sum(xx * weight.reshape(IN), axis=-1, keepdims=True) + bias

    # Small-batch (gridless) path — matches the module's forward at test size.
    out = jax.block_until_ready(simple_model_forward(x, weight, bias))
    assert out.shape == (B, OUT)
    assert jnp.allclose(out, ref_fn(x), atol=1e-5, rtol=1e-5)

    # Sanity-check the lane-packed large-batch path: multi-step grid,
    # partial trailing block (546 packed rows, tile 512) and a 112-row remainder.
    B_big = 70000
    x_big = jax.random.normal(k_x2, (B_big, IN), dtype=jnp.float32)
    out_big = jax.block_until_ready(simple_model_forward(x_big, weight, bias))
    assert out_big.shape == (B_big, OUT)
    assert jnp.allclose(out_big, ref_fn(x_big), atol=1e-4, rtol=1e-4)

    print("KERNEL_OK")
</pallas_src>

<mosaic_0001>
module attributes {stable_mosaic.version = 11 : i64} {
  func.func @_small_linear_kernel(%arg0: memref<1xf32, #tpu.memory_space<smem>>, %arg1: memref<8x10xf32, #tpu.memory_space<vmem>>, %arg2: memref<1x10xf32, #tpu.memory_space<vmem>>, %arg3: memref<8x1xf32, #tpu.memory_space<vmem>>) attributes {dimension_semantics = [], scalar_prefetch = 0 : i64, scratch_operands = 0 : i64, tpu.core_type = #tpu.core_type<tc>} {
    %c0 = arith.constant 0 : index
    %c0_0 = arith.constant 0 : index
    %0 = vector.load %arg1[%c0, %c0_0] : memref<8x10xf32, #tpu.memory_space<vmem>>, vector<8x10xf32>
    %c0_1 = arith.constant 0 : index
    %c0_2 = arith.constant 0 : index
    %1 = vector.load %arg2[%c0_1, %c0_2] : memref<1x10xf32, #tpu.memory_space<vmem>>, vector<1x10xf32>
    %2 = vector.broadcast %1 : vector<1x10xf32> to vector<8x10xf32>
    %3 = arith.mulf %0, %2 : vector<8x10xf32>
    %cst = arith.constant dense<0.000000e+00> : vector<8xf32>
    %4 = vector.multi_reduction <add>, %3, %cst [1] : vector<8x10xf32> to vector<8xf32>
    %5 = vector.shape_cast %4 : vector<8xf32> to vector<8x1xf32>
    %c0_3 = arith.constant 0 : index
    %6 = memref.load %arg0[%c0_3] : memref<1xf32, #tpu.memory_space<smem>>
    %7 = vector.broadcast %6 : f32 to vector<8x1xf32>
    %8 = arith.addf %5, %7 : vector<8x1xf32>
    %c0_4 = arith.constant 0 : index
    %c0_5 = arith.constant 0 : index
    %9 = vector.load %arg3[%c0_4, %c0_5] : memref<8x1xf32, #tpu.memory_space<vmem>>, vector<8x1xf32>
    tpu.vector_store %arg3[%c0_4, %c0_5], %8 {strides = array<i32>} : memref<8x1xf32, #tpu.memory_space<vmem>>, vector<8x1xf32>,
    return
  }
}

</mosaic_0001>

<bundles_post_ra>
// kernel: tpu_custom_call.1
= control target key start
LH: loop header
LB: loop body
LE: loop exit
PB: predicated region body
PF: predicated region fallthrough
CT: control target
= control target key end

     0   :  { %9 = vsyncpa [#allocation4], 0  ;;  %s74_s12 = smov [#allocation3]   ;;  %s107_s0 = inlined_call_operand.<no memory space> [shape: f32[1], index: 0, kind: input, shape index: {}]   ;;  %s108_s1 = inlined_call_operand.hbm [shape: f32[8,10], index: 1, kind: input, shape index: {}]   ;;  %s109_s2 = inlined_call_operand.vmem [shape: f32[1,10], index: 2, kind: input, shape index: {}]   ;;  %s110_s3 = inlined_call_operand.vmem [shape: f32[8,1], index: 3, kind: output, shape index: {}]  }
   0x1   :  { %s18_s13 = sshll.u32 %s74_s12, 4  ;;  %s19_s13 = int_to_ptr.vmem [resolvable:$true] %s18_s13 }
   0x2   :  { %s60_s14 = scalar_lea.vmem %s19_s13, 128  ;;  %p65_p1 = scmp.lt.s32.totalorder %s19_s13, %s19_s13 }
   0x3   :  { %p61_p0 = scmp.ne.s32.totalorder %s19_s13, %s60_s14  ;;  %p66_p2 = scmp.lt.s32.totalorder %s60_s14, %s60_s14 }
   0x5   :  { %p67_p3 = por %p66_p2, %p65_p1 }
   0x7   :  { %p68_p4 = pnand %p67_p3, %p61_p0 }
   0x9   :  { %71 = shalt.err (!%p68_p4)
}
   0xa   :  { %21 = dma.hbm_to_vmem [thread:$0]  %s108_s1, 128, %s19_s13, [#allocation4]  }
   0xb   :  { %72 = dma.done.wait [#allocation4], 128  }
   0xc   :  { %73 = vsyncadd [#allocation4], 4294967168  ;;  %v27_v0 = vld [vmem:[#allocation3] sm:$0xff]  ;;  %vm36_vm0 = vcmask 80896   ;;  %v41_v4 = vstv %s107_s0  ;;  %vm43_vm1 = vcmask 7168  }
   0xd   :  { %v50_v1 = vld [vmem:[%s109_s2] ss:$0 sm:$0xff] }
   0xe   :  { %v35_v2 = vmul.f32 %v50_v1, %v27_v0 }
  0x10   :  { %v37_v3 = vsel %vm36_vm0, %v35_v2, 0.0 }
  0x11   :  { %38 = vadd.xlane.f32.xlu0 %v37_v3 }
  0x9a   :  { %v39_v5 = vpop.xlane.xlu0 %38 }
  0x9b   :  { %v42_v6 = vadd.f32 %v41_v4, %v39_v5 }
  0x9d   :  { %44 = vst.msk [vmem:[%s110_s3] sm:$0xff] %vm43_vm1, %v42_v6 }
  0x9e   :  { %49 = vsyncpa [#allocation4], 1 }

</bundles_post_ra>
